<compile_context>
chip_gen: v7x
topology: tpu7x:2x2x1
jax: 0.10.0
libtpu: 0.0.40
codegen_flags: <defaults>
</compile_context>

<pallas_src>
import functools

import jax
import jax.numpy as jnp
from jax import lax
from jax.experimental import pallas as pl
from jax.experimental.pallas import tpu as pltpu

_LANE = 128


def _dual_tc_chip():
    """Best-effort: True if the addressable device exposes 2 TensorCores (v4/v5p/v7x)."""
    try:
        kind = jax.devices()[0].device_kind.lower()
    except Exception:
        return True
    # v5e / v6e ("lite" chips) have a single TensorCore; splitting buys nothing there.
    if "lite" in kind or "v5e" in kind or "v6e" in kind:
        return False
    return True


def _ce_kernel(logits_ref, tgt_ref, num_ref, den_ref, *,
               class_weight, tile_r, tiles_per_slot, rows_per_batch, needs_mask):
    b = pl.program_id(1)
    r = pl.program_id(2)

    # Zero this slot's resident accumulator blocks at the first "arbitrary" step.
    @pl.when((b == 0) & (r == 0))
    def _init():
        num_ref[...] = jnp.zeros_like(num_ref)
        den_ref[...] = jnp.zeros_like(den_ref)

    num_classes = len(class_weight)

    tgt = tgt_ref[0]                                        # (tile_r, 128) small int
    if tgt.dtype != jnp.int32:
        # One cheap in-kernel widen (VPU); avoids packed-int relayouts on every compare.
        tgt = tgt.astype(jnp.int32)

    def x(c):
        # Re-index the VMEM block per use (vld slots have slack under the DMA); no
        # hoisted list of 4 live f32 temporaries.
        return logits_ref[0, c].astype(jnp.float32)

    # Elementwise (per-voxel) max over classes — pure VPU, no XLU reduce.
    m = x(0)
    for c in range(1, num_classes):
        m = jnp.maximum(m, x(c))

    se = jnp.zeros_like(m)        # sum_c exp(x_c - m)
    picked = jnp.zeros_like(m)    # x[target]
    w_row = jnp.zeros_like(m)     # weight[target]   (0 for out-of-range targets)
    for c in range(num_classes):
        xc = x(c)
        se = se + jnp.exp(xc - m)
        hit = tgt == c
        picked = jnp.where(hit, xc, picked)
        w_row = jnp.where(hit, jnp.float32(class_weight[c]), w_row)

    nll = jnp.log(se) + m - picked                          # -log softmax[target]
    num_c = w_row * nll
    den_c = w_row

    if needs_mask:
        # Zero contributions of rows past the end of the volume.  row0 uses the
        # *unclamped* tile index, so this mask also kills the duplicated tile that the
        # clamped index_map produces when r_tiles doesn't split evenly across nsplit.
        # (Keep this as a select, not a multiply: padded rows may hold inf/NaN.)
        s = pl.program_id(0)
        row0 = (s * tiles_per_slot + r) * tile_r
        row_idx = row0 + lax.broadcasted_iota(jnp.int32, num_c.shape, 0)
        valid = row_idx < rows_per_batch
        num_c = jnp.where(valid, num_c, 0.0)
        den_c = jnp.where(valid, den_c, 0.0)

    # One wide elementwise accumulate per output per step; reduced once in the wrapper.
    num_ref[0] += num_c
    den_ref[0] += den_c


def ce_loss(pred, target, class_weight=(1.0, 2.0, 4.0, 4.0), *,
            tile_rows=2048, nsplit=None):
    """Weighted cross-entropy (PyTorch nn.CrossEntropyLoss(weight=w), 'mean').

    pred:   (B, C, D, H, W), any float dtype (kept native; upcast to f32 in-kernel —
            pass bf16 straight in to halve HBM traffic).
    target: (B, D, H, W) integer class indices in [0, C).  int8/uint8/int32 are consumed
            natively (no extra HBM pass); other int dtypes get one widening cast.
    class_weight: static Python sequence of per-class weights (compile-time constants,
                  matching the module's fixed (1, 2, 4, 4)).
    """
    B, C, D, H, W = pred.shape
    assert len(class_weight) == C
    M = D * H * W
    # TODO(synk): lane-tail masking for volumes where D*H*W is not a multiple of 128
    # (the module's real shape 48*384*512 is).
    assert M % _LANE == 0, "D*H*W must be a multiple of 128"
    R = M // _LANE

    # Free reshapes — no transpose, no dtype cast, no extra HBM pass.
    logits = pred.reshape(B, C, R, _LANE)
    if target.dtype in (jnp.int8, jnp.uint8, jnp.int32):
        tgt = target.reshape(B, R, _LANE)
    else:
        tgt = target.reshape(B, R, _LANE).astype(jnp.int32)

    # Sublane tile of the narrowest dtype touching a (tile_r, 128) block:
    # 8 for 32-bit, 16 for 16-bit logits, 32 for 8-bit targets.
    sub = 8
    if jnp.dtype(logits.dtype).itemsize == 2:
        sub = 16
    if jnp.dtype(tgt.dtype).itemsize == 1:
        sub = max(sub, 32)

    # Row-tile sizing: big lane-dense tiles (~tile_r*128 voxels per grid step),
    # sublane-aligned unless the whole row axis fits in one block.
    tile_r = max(1, min(int(tile_rows), R))
    if tile_r < R:
        tile_r = max(sub, (tile_r // sub) * sub)
        tile_r = min(tile_r, R)

    r_tiles = pl.cdiv(R, tile_r)

    # Leading "parallel" axis: 2 on dual-TensorCore chips (v7x/v5p/v4), 1 on v5e/v6e.
    # Odd r_tiles is handled by clamping the tile index + masking the duplicate tile,
    # so the split never silently falls back to a single core.
    if nsplit is None:
        nsplit = 2 if _dual_tc_chip() else 1
    nsplit = max(1, min(int(nsplit), r_tiles))
    tps = pl.cdiv(r_tiles, nsplit)

    needs_mask = (nsplit * tps * tile_r) != R
    last_tile = r_tiles - 1

    def logits_map(s, b, r):
        return (b, 0, jnp.minimum(s * tps + r, last_tile), 0)

    def tgt_map(s, b, r):
        return (b, jnp.minimum(s * tps + r, last_tile), 0)

    kernel = functools.partial(
        _ce_kernel,
        class_weight=tuple(float(w) for w in class_weight),
        tile_r=tile_r,
        tiles_per_slot=tps,
        rows_per_batch=R,
        needs_mask=needs_mask,
    )

    num, den = pl.pallas_call(
        kernel,
        out_shape=(
            jax.ShapeDtypeStruct((nsplit, tile_r, _LANE), jnp.float32),
            jax.ShapeDtypeStruct((nsplit, tile_r, _LANE), jnp.float32),
        ),
        grid_spec=pltpu.PrefetchScalarGridSpec(
            num_scalar_prefetch=0,
            grid=(nsplit, B, tps),
            in_specs=[
                pl.BlockSpec((1, C, tile_r, _LANE), logits_map),
                pl.BlockSpec((1, tile_r, _LANE), tgt_map),
            ],
            out_specs=(
                pl.BlockSpec((1, tile_r, _LANE), lambda s, b, r: (s, 0, 0)),
                pl.BlockSpec((1, tile_r, _LANE), lambda s, b, r: (s, 0, 0)),
            ),
        ),
        compiler_params=pltpu.CompilerParams(
            dimension_semantics=("parallel", "arbitrary", "arbitrary"),
            # Explicit scoped limit (v5e default is only 16 MiB).  tile_r=2048 f32 uses
            # ~12-14 MiB incl. double-buffering, safely under this on v5e/v6e/v7x.
            vmem_limit_bytes=32 * 1024 * 1024,
        ),
    )(logits, tgt)

    # Tiny final reduction + division (once per call, in XLA).
    return jnp.sum(num) / jnp.sum(den)


def _reference_ce_loss(pred, target, class_weight):
    """Pure-JAX reference of nn.CrossEntropyLoss(weight=w) (mean reduction)."""
    B, C, D, H, W = pred.shape
    logits = jnp.transpose(pred, (0, 2, 3, 4, 1)).reshape(-1, C).astype(jnp.float32)
    tgt = target.reshape(-1).astype(jnp.int32)
    logp = jax.nn.log_softmax(logits, axis=-1)
    nll = -jnp.take_along_axis(logp, tgt[:, None], axis=-1)[:, 0]
    w = jnp.asarray(class_weight, jnp.float32)[tgt]
    return jnp.sum(w * nll) / jnp.sum(w)


if __name__ == "__main__":
    class_weight = (1.0, 2.0, 4.0, 4.0)   # fixed in the module's __init__
    key = jax.random.PRNGKey(0)
    k1, k2, k3, k4, k5, k6 = jax.random.split(key, 6)

    # Test 1: small volume, single row tile per batch, f32 logits / int32 targets.
    B, C, D, H, W = 2, 4, 4, 8, 16        # D*H*W = 512 = 4 * 128
    pred = jax.random.normal(k1, (B, C, D, H, W), dtype=jnp.float32)
    target = jax.random.randint(k2, (B, D, H, W), 0, C, dtype=jnp.int32)
    loss = jax.block_until_ready(ce_loss(pred, target, class_weight))
    ref = jax.block_until_ready(_reference_ce_loss(pred, target, class_weight))
    assert jnp.allclose(loss, ref, rtol=1e-5, atol=1e-5), (loss, ref)

    # Test 2: multi-tile rows, forced 2-way split, ragged (masked) last row tile.
    B, C, D, H, W = 2, 4, 3, 32, 32       # D*H*W = 3072 -> R = 24 rows of 128
    pred2 = jax.random.normal(k3, (B, C, D, H, W), dtype=jnp.float32)
    target2 = jax.random.randint(k4, (B, D, H, W), 0, C, dtype=jnp.int32)
    loss2 = jax.block_until_ready(
        ce_loss(pred2, target2, class_weight, tile_rows=16, nsplit=2))
    ref2 = jax.block_until_ready(_reference_ce_loss(pred2, target2, class_weight))
    assert jnp.allclose(loss2, ref2, rtol=1e-5, atol=1e-5), (loss2, ref2)

    # Test 3: bf16 logits + int8 targets, odd r_tiles with clamped/masked duplicate
    # tile on the 2-way split (R = 96, tile_r rounds to 32 -> r_tiles = 3).
    B, C, D, H, W = 1, 4, 6, 16, 128      # D*H*W = 12288 -> R = 96
    pred3 = jax.random.normal(k5, (B, C, D, H, W), dtype=jnp.float32).astype(jnp.bfloat16)
    target3 = jax.random.randint(k6, (B, D, H, W), 0, C, dtype=jnp.int32).astype(jnp.int8)
    loss3 = jax.block_until_ready(
        ce_loss(pred3, target3, class_weight, tile_rows=16, nsplit=2))
    ref3 = jax.block_until_ready(_reference_ce_loss(pred3, target3, class_weight))
    assert jnp.allclose(loss3, ref3, rtol=1e-4, atol=1e-4), (loss3, ref3)

    print("KERNEL_OK")
</pallas_src>

<mosaic_0001>
module attributes {stable_mosaic.version = 11 : i64} {
  func.func @_ce_kernel(%arg0: i32, %arg1: i32, %arg2: i32, %arg3: memref<1x4x4x128xf32, #tpu.memory_space<vmem>>, %arg4: memref<1x4x128xi32, #tpu.memory_space<vmem>>, %arg5: memref<1x4x128xf32, #tpu.memory_space<vmem>>, %arg6: memref<1x4x128xf32, #tpu.memory_space<vmem>>) attributes {dimension_semantics = [#tpu.dimension_semantics<parallel>, #tpu.dimension_semantics<arbitrary>, #tpu.dimension_semantics<arbitrary>], iteration_bounds = array<i64: 1, 2, 1>, scalar_prefetch = 0 : i64, scratch_operands = 0 : i64, tpu.core_type = #tpu.core_type<tc>, window_params = [{transform_indices = @transform_0, window_bounds = array<i64: 1, 4, 4, 128>}, {transform_indices = @transform_1, window_bounds = array<i64: 1, 4, 128>}, {transform_indices = @transform_2, window_bounds = array<i64: 1, 4, 128>}, {transform_indices = @transform_3, window_bounds = array<i64: 1, 4, 128>}]} {
    %c0_i32 = arith.constant 0 : i32
    %0 = arith.cmpi eq, %arg1, %c0_i32 : i32
    %c0_i32_0 = arith.constant 0 : i32
    %1 = arith.cmpi eq, %arg2, %c0_i32_0 : i32
    %2 = arith.andi %0, %1 : i1
    %3 = arith.extui %2 : i1 to i32
    %c0_i32_1 = arith.constant 0 : i32
    %4 = arith.cmpi ne, %3, %c0_i32_1 : i32
    scf.if %4 {
      %cst_52 = arith.constant 0.000000e+00 : f32
      %77 = vector.broadcast %cst_52 : f32 to vector<1x4x128xf32>
      %c0_53 = arith.constant 0 : index
      %c0_54 = arith.constant 0 : index
      %c0_55 = arith.constant 0 : index
      %78 = vector.load %arg5[%c0_53, %c0_54, %c0_55] : memref<1x4x128xf32, #tpu.memory_space<vmem>>, vector<1x4x128xf32>
      tpu.vector_store %arg5[%c0_53, %c0_54, %c0_55], %77 {strides = array<i32>} : memref<1x4x128xf32, #tpu.memory_space<vmem>>, vector<1x4x128xf32>,
      %cst_56 = arith.constant 0.000000e+00 : f32
      %79 = vector.broadcast %cst_56 : f32 to vector<1x4x128xf32>
      %c0_57 = arith.constant 0 : index
      %c0_58 = arith.constant 0 : index
      %c0_59 = arith.constant 0 : index
      %80 = vector.load %arg6[%c0_57, %c0_58, %c0_59] : memref<1x4x128xf32, #tpu.memory_space<vmem>>, vector<1x4x128xf32>
      tpu.vector_store %arg6[%c0_57, %c0_58, %c0_59], %79 {strides = array<i32>} : memref<1x4x128xf32, #tpu.memory_space<vmem>>, vector<1x4x128xf32>,
    } else {
    }
    %c0 = arith.constant 0 : index
    %c0_2 = arith.constant 0 : index
    %c0_3 = arith.constant 0 : index
    %5 = vector.load %arg4[%c0, %c0_2, %c0_3] : memref<1x4x128xi32, #tpu.memory_space<vmem>>, vector<1x4x128xi32>
    %6 = vector.shape_cast %5 : vector<1x4x128xi32> to vector<4x128xi32>
    %c0_4 = arith.constant 0 : index
    %c0_5 = arith.constant 0 : index
    %c0_6 = arith.constant 0 : index
    %c0_7 = arith.constant 0 : index
    %7 = vector.load %arg3[%c0_4, %c0_5, %c0_6, %c0_7] : memref<1x4x4x128xf32, #tpu.memory_space<vmem>>, vector<1x1x4x128xf32>
    %8 = vector.shape_cast %7 : vector<1x1x4x128xf32> to vector<4x128xf32>
    %c0_8 = arith.constant 0 : index
    %c1 = arith.constant 1 : index
    %c0_9 = arith.constant 0 : index
    %c0_10 = arith.constant 0 : index
    %9 = vector.load %arg3[%c0_8, %c1, %c0_9, %c0_10] : memref<1x4x4x128xf32, #tpu.memory_space<vmem>>, vector<1x1x4x128xf32>
    %10 = vector.shape_cast %9 : vector<1x1x4x128xf32> to vector<4x128xf32>
    %11 = arith.maximumf %8, %10 : vector<4x128xf32>
    %c0_11 = arith.constant 0 : index
    %c2 = arith.constant 2 : index
    %c0_12 = arith.constant 0 : index
    %c0_13 = arith.constant 0 : index
    %12 = vector.load %arg3[%c0_11, %c2, %c0_12, %c0_13] : memref<1x4x4x128xf32, #tpu.memory_space<vmem>>, vector<1x1x4x128xf32>
    %13 = vector.shape_cast %12 : vector<1x1x4x128xf32> to vector<4x128xf32>
    %14 = arith.maximumf %11, %13 : vector<4x128xf32>
    %c0_14 = arith.constant 0 : index
    %c3 = arith.constant 3 : index
    %c0_15 = arith.constant 0 : index
    %c0_16 = arith.constant 0 : index
    %15 = vector.load %arg3[%c0_14, %c3, %c0_15, %c0_16] : memref<1x4x4x128xf32, #tpu.memory_space<vmem>>, vector<1x1x4x128xf32>
    %16 = vector.shape_cast %15 : vector<1x1x4x128xf32> to vector<4x128xf32>
    %17 = arith.maximumf %14, %16 : vector<4x128xf32>
    %cst = arith.constant 0.000000e+00 : f32
    %18 = vector.broadcast %cst : f32 to vector<4x128xf32>
    %cst_17 = arith.constant 0.000000e+00 : f32
    %19 = vector.broadcast %cst_17 : f32 to vector<4x128xf32>
    %cst_18 = arith.constant 0.000000e+00 : f32
    %20 = vector.broadcast %cst_18 : f32 to vector<4x128xf32>
    %c0_19 = arith.constant 0 : index
    %c0_20 = arith.constant 0 : index
    %c0_21 = arith.constant 0 : index
    %c0_22 = arith.constant 0 : index
    %21 = vector.load %arg3[%c0_19, %c0_20, %c0_21, %c0_22] : memref<1x4x4x128xf32, #tpu.memory_space<vmem>>, vector<1x1x4x128xf32>
    %22 = vector.shape_cast %21 : vector<1x1x4x128xf32> to vector<4x128xf32>
    %23 = arith.subf %22, %17 : vector<4x128xf32>
    %24 = math.exp %23 : vector<4x128xf32>
    %25 = arith.addf %18, %24 : vector<4x128xf32>
    %c0_i32_23 = arith.constant 0 : i32
    %26 = vector.broadcast %c0_i32_23 : i32 to vector<4x128xi32>
    %27 = arith.cmpi eq, %6, %26 : vector<4x128xi32>
    %28 = arith.select %27, %22, %19 : vector<4x128xi1>, vector<4x128xf32>
    %cst_24 = arith.constant 1.000000e+00 : f32
    %29 = vector.broadcast %cst_24 : f32 to vector<4x128xf32>
    %30 = arith.select %27, %29, %20 : vector<4x128xi1>, vector<4x128xf32>
    %c0_25 = arith.constant 0 : index
    %c1_26 = arith.constant 1 : index
    %c0_27 = arith.constant 0 : index
    %c0_28 = arith.constant 0 : index
    %31 = vector.load %arg3[%c0_25, %c1_26, %c0_27, %c0_28] : memref<1x4x4x128xf32, #tpu.memory_space<vmem>>, vector<1x1x4x128xf32>
    %32 = vector.shape_cast %31 : vector<1x1x4x128xf32> to vector<4x128xf32>
    %33 = arith.subf %32, %17 : vector<4x128xf32>
    %34 = math.exp %33 : vector<4x128xf32>
    %35 = arith.addf %25, %34 : vector<4x128xf32>
    %c1_i32 = arith.constant 1 : i32
    %36 = vector.broadcast %c1_i32 : i32 to vector<4x128xi32>
    %37 = arith.cmpi eq, %6, %36 : vector<4x128xi32>
    %38 = arith.select %37, %32, %28 : vector<4x128xi1>, vector<4x128xf32>
    %cst_29 = arith.constant 2.000000e+00 : f32
    %39 = vector.broadcast %cst_29 : f32 to vector<4x128xf32>
    %40 = arith.select %37, %39, %30 : vector<4x128xi1>, vector<4x128xf32>
    %c0_30 = arith.constant 0 : index
    %c2_31 = arith.constant 2 : index
    %c0_32 = arith.constant 0 : index
    %c0_33 = arith.constant 0 : index
    %41 = vector.load %arg3[%c0_30, %c2_31, %c0_32, %c0_33] : memref<1x4x4x128xf32, #tpu.memory_space<vmem>>, vector<1x1x4x128xf32>
    %42 = vector.shape_cast %41 : vector<1x1x4x128xf32> to vector<4x128xf32>
    %43 = arith.subf %42, %17 : vector<4x128xf32>
    %44 = math.exp %43 : vector<4x128xf32>
    %45 = arith.addf %35, %44 : vector<4x128xf32>
    %c2_i32 = arith.constant 2 : i32
    %46 = vector.broadcast %c2_i32 : i32 to vector<4x128xi32>
    %47 = arith.cmpi eq, %6, %46 : vector<4x128xi32>
    %48 = arith.select %47, %42, %38 : vector<4x128xi1>, vector<4x128xf32>
    %cst_34 = arith.constant 4.000000e+00 : f32
    %49 = vector.broadcast %cst_34 : f32 to vector<4x128xf32>
    %50 = arith.select %47, %49, %40 : vector<4x128xi1>, vector<4x128xf32>
    %c0_35 = arith.constant 0 : index
    %c3_36 = arith.constant 3 : index
    %c0_37 = arith.constant 0 : index
    %c0_38 = arith.constant 0 : index
    %51 = vector.load %arg3[%c0_35, %c3_36, %c0_37, %c0_38] : memref<1x4x4x128xf32, #tpu.memory_space<vmem>>, vector<1x1x4x128xf32>
    %52 = vector.shape_cast %51 : vector<1x1x4x128xf32> to vector<4x128xf32>
    %53 = arith.subf %52, %17 : vector<4x128xf32>
    %54 = math.exp %53 : vector<4x128xf32>
    %55 = arith.addf %45, %54 : vector<4x128xf32>
    %c3_i32 = arith.constant 3 : i32
    %56 = vector.broadcast %c3_i32 : i32 to vector<4x128xi32>
    %57 = arith.cmpi eq, %6, %56 : vector<4x128xi32>
    %58 = arith.select %57, %52, %48 : vector<4x128xi1>, vector<4x128xf32>
    %cst_39 = arith.constant 4.000000e+00 : f32
    %59 = vector.broadcast %cst_39 : f32 to vector<4x128xf32>
    %60 = arith.select %57, %59, %50 : vector<4x128xi1>, vector<4x128xf32>
    %61 = math.log %55 : vector<4x128xf32>
    %62 = arith.addf %61, %17 : vector<4x128xf32>
    %63 = arith.subf %62, %58 : vector<4x128xf32>
    %64 = arith.mulf %60, %63 : vector<4x128xf32>
    %c0_40 = arith.constant 0 : index
    %c0_41 = arith.constant 0 : index
    %c0_42 = arith.constant 0 : index
    %65 = vector.load %arg5[%c0_40, %c0_41, %c0_42] : memref<1x4x128xf32, #tpu.memory_space<vmem>>, vector<1x4x128xf32>
    %66 = vector.shape_cast %65 : vector<1x4x128xf32> to vector<4x128xf32>
    %67 = arith.addf %66, %64 : vector<4x128xf32>
    %c0_43 = arith.constant 0 : index
    %c0_44 = arith.constant 0 : index
    %c0_45 = arith.constant 0 : index
    %68 = vector.load %arg5[%c0_43, %c0_44, %c0_45] : memref<1x4x128xf32, #tpu.memory_space<vmem>>, vector<1x4x128xf32>
    %69 = vector.shape_cast %68 : vector<1x4x128xf32> to vector<4x128xf32>
    %70 = vector.shape_cast %67 : vector<4x128xf32> to vector<1x4x128xf32>
    tpu.vector_store %arg5[%c0_43, %c0_44, %c0_45], %70 {strides = array<i32>} : memref<1x4x128xf32, #tpu.memory_space<vmem>>, vector<1x4x128xf32>,
    %c0_46 = arith.constant 0 : index
    %c0_47 = arith.constant 0 : index
    %c0_48 = arith.constant 0 : index
    %71 = vector.load %arg6[%c0_46, %c0_47, %c0_48] : memref<1x4x128xf32, #tpu.memory_space<vmem>>, vector<1x4x128xf32>
    %72 = vector.shape_cast %71 : vector<1x4x128xf32> to vector<4x128xf32>
    %73 = arith.addf %72, %60 : vector<4x128xf32>
    %c0_49 = arith.constant 0 : index
    %c0_50 = arith.constant 0 : index
    %c0_51 = arith.constant 0 : index
    %74 = vector.load %arg6[%c0_49, %c0_50, %c0_51] : memref<1x4x128xf32, #tpu.memory_space<vmem>>, vector<1x4x128xf32>
    %75 = vector.shape_cast %74 : vector<1x4x128xf32> to vector<4x128xf32>
    %76 = vector.shape_cast %73 : vector<4x128xf32> to vector<1x4x128xf32>
    tpu.vector_store %arg6[%c0_49, %c0_50, %c0_51], %76 {strides = array<i32>} : memref<1x4x128xf32, #tpu.memory_space<vmem>>, vector<1x4x128xf32>,
    return
  }
  func.func @transform_0(%arg0: i32, %arg1: i32, %arg2: i32) -> (i32, i32, i32, i32) {
    %c1_i32 = arith.constant 1 : i32
    %0 = arith.muli %arg0, %c1_i32 : i32
    %1 = arith.addi %0, %arg2 : i32
    %c0_i32 = arith.constant 0 : i32
    %2 = arith.minsi %1, %c0_i32 : i32
    %c0_i32_0 = arith.constant 0 : i32
    %c0_i32_1 = arith.constant 0 : i32
    %c0_i32_2 = arith.constant 0 : i32
    return %arg1, %c0_i32_0, %2, %c0_i32_1 : i32, i32, i32, i32
  }
  func.func @transform_1(%arg0: i32, %arg1: i32, %arg2: i32) -> (i32, i32, i32) {
    %c1_i32 = arith.constant 1 : i32
    %0 = arith.muli %arg0, %c1_i32 : i32
    %1 = arith.addi %0, %arg2 : i32
    %c0_i32 = arith.constant 0 : i32
    %2 = arith.minsi %1, %c0_i32 : i32
    %c0_i32_0 = arith.constant 0 : i32
    %c0_i32_1 = arith.constant 0 : i32
    return %arg1, %2, %c0_i32_0 : i32, i32, i32
  }
  func.func @transform_2(%arg0: i32, %arg1: i32, %arg2: i32) -> (i32, i32, i32) {
    %c0_i32 = arith.constant 0 : i32
    %c0_i32_0 = arith.constant 0 : i32
    %c0_i32_1 = arith.constant 0 : i32
    return %arg0, %c0_i32, %c0_i32_0 : i32, i32, i32
  }
  func.func @transform_3(%arg0: i32, %arg1: i32, %arg2: i32) -> (i32, i32, i32) {
    %c0_i32 = arith.constant 0 : i32
    %c0_i32_0 = arith.constant 0 : i32
    %c0_i32_1 = arith.constant 0 : i32
    return %arg0, %c0_i32, %c0_i32_0 : i32, i32, i32
  }
}

</mosaic_0001>

<bundles_post_ra>
// kernel: tpu_custom_call.1
= control target key start
LH: loop header
LB: loop body
LE: loop exit
PB: predicated region body
PF: predicated region fallthrough
CT: control target
= control target key end

     0   :  { %9 = vsyncpa [#allocation3], 0  ;;  %s1004_s0 = inlined_call_operand.hbm [shape: f32[2,4,4,128], index: 0, kind: input, shape index: {}]   ;;  %s1005_s1 = inlined_call_operand.hbm [shape: s32[2,4,128], index: 1, kind: input, shape index: {}]   ;;  %s1006_s2 = inlined_call_operand.hbm [shape: f32[1,4,128], index: 2, kind: output, shape index: {0}]   ;;  %s1007_s3 = inlined_call_operand.hbm [shape: f32[1,4,128], index: 3, kind: output, shape index: {1}]  }
   0x1   :  { %11 = vsyncpa [#allocation3 + $0x1], 0 }
   0x2   :  { %12 = vsyncpa [#allocation6], 0 }
   0x3   :  { %14 = vsyncpa [#allocation6 + $0x1], 0 }
   0x4   :  { %15 = vsyncpa [#allocation4], 0 }
   0x5   :  { %16 = vsyncpa [#allocation9], 0  ;;  %s770_s12 = smov 0   ;;  %s772_s13 = smov 0  }
   0x6   :  { %s774_s14 = smov 0   ;;  %s776_s15 = smov 0  }
   0x7   :  { %s778_s16 = smov 0   ;;  %s780_s17 = smov 0  }
   0x8 LB: > { %s455_s18 = sadd.s32 4294967295, %s740_s17   ;;  %s37_s19 = sadd.s32 1, %s736_s16  ;;  %s740_s17 = sphi %s780_s17, %s22_s17   ;;  %s736_s16 = sphi %s778_s16, %s1020_s16   ;;  %s732_s15 = sphi %s776_s15, %s1019_s15   ;;  %s728_s14 = sphi %s774_s14, %s1018_s14   ;;  %s724_s13 = sphi %s772_s13, %s1017_s13   ;;  %s720_s12 = sphi %s770_s12, %s1016_s12  }
   0x9   : > { %p39_p0 = scmp.ge.s32.totalorder %s37_s19, 2  ;;  %s56_s20 = sadd.s32 1, %s728_s14 }
   0xa   : > { %p63_p1 = scmp.ne.s32.totalorder %s728_s14, %s724_s13  ;;  %p64_p2 = scmp.eq.s32.totalorder %s740_s17, 0 }
   0xb   : > { %s1022_s19 = smov (%p39_p0, %s37_s19), 0  ;;  %p69_p4 = scmp.ne.s32.totalorder %s724_s13, %s720_s12 }
   0xc   : > { %p806_p3 = por %p64_p2, %p63_p1  ;;  %s51_s22 = ssub.s32 %s736_s16, %s1022_s19 }
   0xd   : > { %p70_p5 = scmp.eq.s32.totalorder %s455_s18, 0  ;;  %p54_p6 = scmp.eq.s32.totalorder %s51_s22, 0 }
   0xe   : > { %p497_p8 = scmp.lt.s32.totalorder %s740_s17, 2  ;;  %s824_s25 = sand.u32 1, %s728_s14  }
   0xf   : > { %p815_p7 = por %p70_p5, %p69_p4  ;;  %s476_s26 = sshll.u32 %s736_s16, 8 }
  0x10   : > { %s821_s24 = scalar_select %p54_p6, %s728_s14, %s56_s20  }
  0x11   : > { %s1010_s23 = scalar_select %p815_p7, 1, 0 }
  0x12   : > { %s458_s27 = sshll.u32 %s824_s25, 4  ;;  %s831_s30 = scalar_lea.hbm %s1004_s0, %s476_s26 }
  0x13   : > { %s183_s4 = scalar_lea.vmem [#allocation2], %s458_s27  ;;  %p835_p9 = pnand %p497_p8, %p806_p3 }
  0x14   : > { %s194_s5 = sshll.u32 %s183_s4, 4  ;;  %s180_s7 = scalar_lea.sflag [#allocation3], %s824_s25  ;;  %s839_s5 = int_to_ptr.vmem [resolvable:$true] %s194_s5 }
  0x15   : > { %s566_s8 = scalar_lea.hbm %s831_s30, 256  ;;  %p568_p11 = pneg %p835_p9 }
  0x16   : > { %p567_p10 = scmp.ne.s32.totalorder %s831_s30, %s566_s8  ;;  %s571_s11 = scalar_lea.hbm %s1004_s0, 512 }
  0x17   : > { %p572_p0 = scmp.lt.u32.totalorder %s831_s30, %s1004_s0  ;;  %p573_p1 = scmp.lt.u32.totalorder %s571_s11, %s566_s8 }
  0x18   : > { %p569_p12 = pnand %p568_p11, %p567_p10  ;;  %p575_p3 = scmp.lt.u32.totalorder %s566_s8, %s831_s30 }
  0x19   : > { %p574_p2 = por %p573_p1, %p572_p0 }
  0x1a   : > { %p570_p13 = pneg %p569_p12 }
  0x1b   : > { %p576_p4 = por %p575_p3, %p574_p2 }
  0x1d   : > { %p577_p5 = pnand %p576_p4, %p570_p13 }
  0x1f   : > { %580 = shalt.err (!%p577_p5)
}
  0x20   : > { %s581_s21 = scalar_lea.vmem %s839_s5, 256  ;;  %s742_s22 = smov [#allocation2]  }
  0x21   : > { %p582_p6 = scmp.ne.s32.totalorder %s839_s5, %s581_s21  ;;  %s586_s26 = sshll.u32 %s742_s22, 4  ;;  %s587_s26 = int_to_ptr.vmem [resolvable:$false] %s586_s26 }
  0x22   : > { %s588_s27 = scalar_lea.vmem %s587_s26, 512  ;;  %p589_p12 = scmp.lt.s32.totalorder %s839_s5, %s587_s26 }
  0x23   : > { %p584_p8 = pnand %p582_p6, %p568_p11  ;;  %p590_p0 = scmp.lt.s32.totalorder %s588_s27, %s581_s21 }
  0x25   : > { %p585_p10 = pneg %p584_p8  ;;  %p591_p1 = por %p590_p0, %p589_p12 }
  0x27   : > { %p592_p2 = pnand %p591_p1, %p585_p10 }
  0x29   : > { %595 = shalt.err (!%p592_p2)
}
  0x2a   : > { %s743_s28 = smov 64   ;;  %s744_s29 = smov 4  }
  0x2b   : > { %493 = dma.hbm_to_vmem [thread:$0]  (!%p835_p9), %s831_s30, 256, %s839_s5, %s180_s7, %s743_s28, %s743_s28, %s744_s29  }
  0x2c   : > { %p463_p13 = scmp.ge.s32.totalorder %s740_s17, 1  ;;  %p224_p3 = scmp.lt.s32.totalorder %s740_s17, 3 }
  0x2d   : > { %s461_s4 = sshll.u32 %s824_s25, 2  ;;  %s462_s9 = sshll.u32 %s736_s16, 6 }
  0x2e   : > { %p872_p4 = pnand %p463_p13, %p224_p3  ;;  %s208_s10 = scalar_lea.vmem [#allocation5], %s461_s4 }
  0x2f   : > { %s219_s11 = sshll.u32 %s208_s10, 4  ;;  %s880_s21 = scalar_lea.hbm %s1005_s1, %s462_s9  ;;  %s220_s11 = int_to_ptr.vmem [resolvable:$true] %s219_s11 }
  0x30   : > { %s1012_s8 = scalar_select %p872_p4, 1, 0 }
  0x31   : > { %s205_s30 = scalar_lea.sflag [#allocation6], %s824_s25  ;;  %s596_s5 = scalar_lea.hbm %s880_s21, 64 }
  0x32   : > { %p597_p5 = scmp.ne.s32.totalorder %s880_s21, %s596_s5  ;;  %s601_s26 = scalar_lea.hbm %s1005_s1, 128 }
  0x33   : > { %p602_p10 = scmp.lt.u32.totalorder %s880_s21, %s1005_s1  ;;  %p603_p12 = scmp.lt.u32.totalorder %s601_s26, %s596_s5 }
  0x34   : > { %p599_p6 = pnand %p597_p5, %p568_p11  ;;  %p605_p1 = scmp.lt.u32.totalorder %s596_s5, %s880_s21 }
  0x35   : > { %p604_p0 = por %p603_p12, %p602_p10 }
  0x36   : > { %p600_p8 = pneg %p599_p6 }
  0x37   : > { %p606_p2 = por %p605_p1, %p604_p0 }
  0x39   : > { %p607_p13 = pnand %p606_p2, %p600_p8 }
  0x3b   : > { %610 = shalt.err (!%p607_p13)
}
  0x3c   : > { %s611_s25 = scalar_lea.vmem %s220_s11, 64  ;;  %s745_s29 = smov [#allocation5]  }
  0x3d   : > { %p612_p3 = scmp.ne.s32.totalorder %s220_s11, %s611_s25  ;;  %s616_s4 = sshll.u32 %s745_s29, 4  ;;  %s617_s4 = int_to_ptr.vmem [resolvable:$false] %s616_s4 }
  0x3e   : > { %s618_s9 = scalar_lea.vmem %s617_s4, 128  ;;  %p619_p7 = scmp.lt.s32.totalorder %s220_s11, %s617_s4 }
  0x3f   : > { %p614_p5 = pnand %p612_p3, %p568_p11  ;;  %p620_p4 = scmp.lt.s32.totalorder %s618_s9, %s611_s25 }
  0x41   : > { %p615_p6 = pneg %p614_p5  ;;  %p621_p10 = por %p620_p4, %p619_p7 }
  0x43   : > { %p622_p12 = pnand %p621_p10, %p615_p6 }
  0x45   : > { %625 = shalt.err (!%p622_p12)
}
  0x46   : > { %496 = dma.hbm_to_vmem [thread:$0]  (!%p835_p9), %s880_s21, 64, %s220_s11, %s205_s30  }
  0x47   : > { %p1013_p8 = scmp.ne.s32.totalorder %s1012_s8, 0 }
  0x48   : > { %s230_s10 = sand.u32 (!%p1013_p8), 1, %s724_s13   ;;  %p1014_p11 = scmp.ne.s32.totalorder (!%p1013_p8), %s1010_s23, 0 }
  0x49   : > { %228 = sbr.rel (%p1013_p8) target bundleno = 173 (0xad), region = 28  ;;  %s464_s12 = sshll.u32 (!%p1013_p8), %s230_s10, 4 }
  0x4a   : > { %s231_s20 = scalar_lea.sflag (!%p1013_p8), [#allocation3], %s230_s10  ;;  %s234_s5 = scalar_lea.vmem (!%p1013_p8), [#allocation2], %s464_s12 }
  0x50   : > { %703 = dma.done.wait (%p1014_p11), %s231_s20, 256  }
  0x51   : > { %705 = vsyncadd (%p1014_p11), %s231_s20, 4294967040  ;;  %s465_s7 = sshll.u32 %s230_s10, 2  ;;  %s240_s22 = scalar_lea.sflag [#allocation6], %s230_s10 }
  0x52   : > { %s243_s6 = scalar_lea.vmem [#allocation5], %s465_s7 }
  0x53   : > { %707 = dma.done.wait (%p1014_p11), %s240_s22, 64  }
  0x54   : > { %709 = vsyncadd (%p1014_p11), %s240_s22, 4294967232  ;;  %p272_p7 = scmp.eq.s32.totalorder %s732_s15, 0 }
  0x55   : > { %v746_v0 = vmov (%p272_p7), 0.0  }
  0x56   : > { %277 = sbr.rel (!%p272_p7) target bundleno = 93 (0x5d), region = 40  ;;  %278 = vst [vmem:[#allocation7] sm:$0xf] (%p272_p7), %v746_v0  ;;  %279 = vst [vmem:[#allocation8] sm:$0xf] (%p272_p7), %v746_v0 }
  0x5d PF: > { %v914_v1 = vld [vmem:[%s243_s6] sm:$0xf]  ;;  %v467_v3 = vld [vmem:[%s234_s5 + $0x4] sm:$0xf]  ;;  %v468_v5 = vld [vmem:[%s234_s5 + $0x8] sm:$0xf] }
  0x5e   : > { %v281_v2 = vld [vmem:[%s234_s5] sm:$0xf]  ;;  %vm295_vm0 = vcmp.eq.s32.totalorder %v914_v1, 0  ;;  %v469_v6 = vld [vmem:[%s234_s5 + $0xc] sm:$0xf]  ;;  %v747_v7 = vmov 0.0  }
  0x5f   : > { %v284_v4 = vmax.f32 %v281_v2, %v467_v3  ;;  %v297_v8 = vsel %vm295_vm0, 1.0, %v747_v7  ;;  %vm302_vm1 = vcmp.eq.s32.totalorder %v914_v1, 1  ;;  %vm309_vm2 = vcmp.eq.s32.totalorder %v914_v1, 2  ;;  %v327_v11 = vld [vmem:[#allocation8] sm:$0xf]  ;;  %s748_s15 = smov [#allocation8]  }
  0x60   : > { %v304_v10 = vsel %vm302_vm1, 2.0, %v297_v8  ;;  %vm316_vm3 = vcmp.eq.s32.totalorder %v914_v1, 3  ;;  %s352_s23 = sshll.u32 %s748_s15, 4  ;;  %p930_p9 = scmp.eq.s32.totalorder %s455_s18, 1  ;;  %s353_s23 = int_to_ptr.vmem [resolvable:$true] %s352_s23 }
  0x61   : > { %v287_v9 = vmax.f32 %v284_v4, %v468_v5  ;;  %v311_v12 = vsel %vm309_vm2, 4.0, %v304_v10  ;;  %s626_s11 = scalar_lea.vmem %s353_s23, 64  ;;  %p633_p2 = scmp.lt.s32.totalorder %s353_s23, %s353_s23 }
  0x62   : > { %v318_v14 = vsel %vm316_vm3, 4.0, %v311_v12  ;;  %p627_p4 = scmp.ne.s32.totalorder %s353_s23, %s626_s11  ;;  %p634_p13 = scmp.lt.s32.totalorder %s626_s11, %s626_s11 }
  0x63   : > { %v290_v13 = vmax.f32 %v287_v9, %v469_v6  ;;  %v328_v15 = vadd.f32 %v327_v11, %v318_v14 }
  0x64   : > { %p628_p0 = pnand %p627_p4, %p930_p9  ;;  %p635_p3 = por %p634_p13, %p633_p2 }
  0x65   : > { %v291_v16 = vsub.f32 %v281_v2, %v290_v13  ;;  %v298_v17 = vsub.f32 %v467_v3, %v290_v13  ;;  %v305_v18 = vsub.f32 %v468_v5, %v290_v13  ;;  %v312_v19 = vsub.f32 %v469_v6, %v290_v13  ;;  %329 = vst [vmem:[#allocation8] sm:$0xf] %v328_v15 }
  0x66   : > { %p629_p1 = pneg %p628_p0 }
  0x67   : > { %v292_v20 = vmul.f32 1.442695, %v291_v16  ;;  %v299_v21 = vmul.f32 1.442695, %v298_v17  ;;  %v306_v22 = vmul.f32 1.442695, %v305_v18 }
  0x68   : > { %v313_v23 = vmul.f32 1.442695, %v312_v19  ;;  %p636_p5 = pnand %p635_p3, %p629_p1 }
  0x6a   : > { %639 = shalt.err (!%p636_p5)
}
  0x6b   : > { %s640_s30 = scalar_lea.hbm %s1007_s3, 64 }
  0x6c   : > { %p641_p6 = scmp.ne.s32.totalorder %s1007_s3, %s640_s30  ;;  %p646_p8 = scmp.lt.u32.totalorder %s640_s30, %s1007_s3 }
  0x6e   : > { %p642_p10 = pnand %p641_p6, %p930_p9 }
  0x70   : > { %p643_p12 = pneg %p642_p10 }
  0x72   : > { %p648_p11 = pnand %p646_p8, %p643_p12 }
  0x74   : > { %651 = shalt.err (!%p648_p11)
}
  0x75   : > { %485 = dma.vmem_to_hbm [thread:$0]  (%p930_p9), %s353_s23, 64, %s1007_s3, [#allocation9]   ;;  %556 = vpow2.f32 %v292_v20  ;;  %v296_v31 = vsel %vm295_vm0, %v281_v2, 0.0  ;;  %v324_v39 = vld [vmem:[#allocation7] sm:$0xf] }
  0x76   : > { %558 = vpow2.f32 %v299_v21  ;;  %v303_v32 = vsel %vm302_vm1, %v467_v3, %v296_v31  ;;  %s749_s9 = smov [#allocation7]  }
  0x77   : > { %560 = vpow2.f32 %v306_v22  ;;  %v310_v33 = vsel %vm309_vm2, %v468_v5, %v303_v32  ;;  %s339_s10 = sshll.u32 %s749_s9, 4  ;;  %s340_s10 = int_to_ptr.vmem [resolvable:$true] %s339_s10 }
  0x78   : > { %562 = vpow2.f32 %v313_v23  ;;  %v317_v36 = vsel %vm316_vm3, %v469_v6, %v310_v33  ;;  %s652_s12 = scalar_lea.vmem %s340_s10, 64  ;;  %p659_p1 = scmp.lt.s32.totalorder %s340_s10, %s340_s10 }
  0x79   : > { %p653_p7 = scmp.ne.s32.totalorder %s340_s10, %s652_s12  ;;  %p660_p2 = scmp.lt.s32.totalorder %s652_s12, %s652_s12 }
  0x7b   : > { %p654_p4 = pnand %p653_p7, %p930_p9  ;;  %p661_p13 = por %p660_p2, %p659_p1 }
  0x7d   : > { %p655_p0 = pneg %p654_p4 }
  0x7f   : > { %v557_v24 = vpop.eup %556  ;;  %p662_p3 = pnand %p661_p13, %p655_p0 }
  0x80   : > { %v559_v25 = vpop.eup %558 }
  0x81   : > { %v561_v26 = vpop.eup %560  ;;  %v301_v27 = vadd.f32 %v559_v25, %v557_v24 }
  0x82   : > { %v563_v28 = vpop.eup %562 }
  0x83   : > { %v308_v29 = vadd.f32 %v561_v26, %v301_v27 }
  0x85   : > { %v315_v30 = vadd.f32 %v563_v28, %v308_v29 }
  0x87   : > { %564 = vlog2.f32 %v315_v30 }
  0x91   : > { %v565_v34 = vpop.eup %564 }
  0x92   : > { %v320_v35 = vmul.f32 0.6931472, %v565_v34 }
  0x94   : > { %v321_v37 = vadd.f32 %v320_v35, %v290_v13 }
  0x96   : > { %v322_v38 = vsub.f32 %v321_v37, %v317_v36 }
  0x98   : > { %v323_v40 = vmul.f32 %v322_v38, %v318_v14 }
  0x9a   : > { %v325_v41 = vadd.f32 %v324_v39, %v323_v40 }
  0x9c   : > { %326 = vst [vmem:[#allocation7] sm:$0xf] %v325_v41 }
  0x9d   : > { %665 = shalt.err (!%p662_p3)
}
  0x9e   : > { %s666_s7 = scalar_lea.hbm %s1006_s2, 64 }
  0x9f   : > { %p667_p5 = scmp.ne.s32.totalorder %s1006_s2, %s666_s7  ;;  %p672_p12 = scmp.lt.u32.totalorder %s666_s7, %s1006_s2 }
  0xa1   : > { %p668_p6 = pnand %p667_p5, %p930_p9 }
  0xa3   : > { %p669_p10 = pneg %p668_p6 }
  0xa5   : > { %p674_p8 = pnand %p672_p12, %p669_p10 }
  0xa7   : > { %677 = shalt.err (!%p674_p8)
}
  0xa8   : > { %483 = dma.vmem_to_hbm [thread:$0]  (%p930_p9), %s340_s10, 64, %s1006_s2, [#allocation4]  }
  0xa9   : > { %711 = dma.done.wait (%p930_p9), [#allocation4], 64  }
  0xaa   : > { %713 = vsyncadd (%p930_p9), [#allocation4], 4294967232 }
  0xab   : > { %715 = dma.done.wait (%p930_p9), [#allocation9], 64  }
  0xac   : > { %717 = vsyncadd (%p930_p9), [#allocation9], 4294967232 }
  0xad PF: > { %s22_s17 = sadd.s32 1, %s740_s17   ;;  %s1016_s12 = smov %s724_s13 }
  0xae   : > { %p19_p11 = scmp.ge.s32.totalorder %s22_s17, 4   ;;  %s1017_s13 = smov %s728_s14 }
  0xaf   : > { %s1018_s14 = smov %s821_s24  ;;  %s1019_s15 = smov %s736_s16 }
  0xb0   : > { %s1020_s16 = smov %s1022_s19  ;;  %21 = sbr.rel (!%p19_p11) target bundleno = 8 (0x8), region = 95 }
  0xb7   :  { %369 = vsyncpa [#allocation3], 1 }
  0xb8   :  { %371 = vsyncpa [#allocation3 + $0x1], 1 }
  0xb9   :  { %372 = vsyncpa [#allocation6], 1 }
  0xba   :  { %374 = vsyncpa [#allocation6 + $0x1], 1 }
  0xbb   :  { %375 = vsyncpa [#allocation4], 1 }
  0xbc   :  { %377 = vsyncpa [#allocation4 + $0x1], 1 }
  0xbd   :  { %378 = vsyncpa [#allocation9], 1 }

</bundles_post_ra>
